<compile_context>
chip_gen: v6e
topology: v6e:2x2x1
jax: 0.10.0
libtpu: 0.0.40
codegen_flags: <defaults>
</compile_context>

<pallas_src>
import jax
import jax.numpy as jnp
from jax.experimental import pallas as pl
from jax.experimental.pallas import tpu as pltpu

SPIKE_THRESHOLD = 1.0
# Padded (zero-weight) output lanes produce membrane 0; they stay silent only
# because the threshold is positive.
assert SPIKE_THRESHOLD > 0.0

# Original / padded feature dims.
D_IN = 784
N1, N2, N3 = 500, 200, 100
N1P, N2P, N3P = 512, 256, 128   # lane-dense (multiple of 128) padded dims


def _round_up(x, m):
    return ((x + m - 1) // m) * m


def _pad_to(a, shape):
    pads = [(0, t - s) for s, t in zip(a.shape, shape)]
    return jnp.pad(a, pads)


def prepare_params(w1, w2, w3):
    """Zero-pad weights to 128-lane multiples and cast to bf16 (done once).

    Padded output columns have zero weights -> membrane 0 -> no spike (threshold
    > 0), and the padded K rows of the next layer are zero, so padding is inert.
    """
    w1p = _pad_to(w1, (D_IN, N1P)).astype(jnp.bfloat16)
    w2p = _pad_to(w2, (N1P, N2P)).astype(jnp.bfloat16)
    w3p = _pad_to(w3, (N2P, N3P)).astype(jnp.bfloat16)
    return w1p, w2p, w3p


def _choose_bm(batch, block_batch):
    """Pick (bm, padded_batch): tiles <= block_batch, >=2 grid steps when the
    batch allows it (v7x megacore), bm a multiple of 128 when large."""
    b8 = _round_up(max(batch, 1), 8)
    if b8 <= 8:
        return 8, 8  # tiny batch: a single 8-row tile
    n_tiles = max(2, pl.cdiv(b8, block_batch))
    bm = _round_up(pl.cdiv(b8, n_tiles), 8)
    if bm >= 128:
        bm = _round_up(bm, 128)
    b_pad = _round_up(b8, bm)
    return bm, b_pad


def _stdp_mlp_kernel(x_ref, w1_ref, w2_ref, w3_ref, out_ref):
    """One batch tile through the whole 3-layer chain.

    x_ref : (bm, 784) bf16/f32     w1_ref: (784, 512) bf16
    w2_ref: (512, 256) bf16        w3_ref: (256, 128) bf16
    out_ref: (bm, 128) bf16 -- last-layer spikes (0.0 / 1.0), lane-dense.
    """
    # bf16 MXU operands, f32 accumulation; no-op cast when x is already bf16.
    x = x_ref[...].astype(jnp.bfloat16)

    # Layer 1: 784 -> 512 (500 real); threshold compare stays in f32.
    m1 = jnp.dot(x, w1_ref[...], preferred_element_type=jnp.float32)
    s1 = (m1 >= SPIKE_THRESHOLD).astype(jnp.bfloat16)  # exact 0/1 in bf16

    # Layer 2: 512 -> 256 (200 real)
    m2 = jnp.dot(s1, w2_ref[...], preferred_element_type=jnp.float32)
    s2 = (m2 >= SPIKE_THRESHOLD).astype(jnp.bfloat16)

    # Layer 3: 256 -> 128 (100 real)
    m3 = jnp.dot(s2, w3_ref[...], preferred_element_type=jnp.float32)
    out_ref[...] = (m3 >= SPIKE_THRESHOLD).astype(out_ref.dtype)


def simple_linear_forward(x, w1p, w2p, w3p, *, block_batch=512):
    """x: [B, 784] (ideally bf16 from the producer); w*p: padded bf16 weights.

    Returns [B, 100] bf16 spikes (exact 0.0/1.0); cast downstream only if the
    consumer truly needs f32.
    """
    B = x.shape[0]
    bm, B_pad = _choose_bm(B, block_batch)
    if B_pad != B:
        x = jnp.pad(x, ((0, B_pad - B), (0, 0)))

    x_bytes = jnp.dtype(x.dtype).itemsize
    flops = 2 * B_pad * (D_IN * N1P + N1P * N2P + N2P * N3P)
    bytes_accessed = (
        x.size * x_bytes
        + (w1p.size + w2p.size + w3p.size) * 2
        + B_pad * N3P * 2
    )

    out_padded = pl.pallas_call(
        _stdp_mlp_kernel,
        out_shape=jax.ShapeDtypeStruct((B_pad, N3P), jnp.bfloat16),
        grid_spec=pltpu.PrefetchScalarGridSpec(
            num_scalar_prefetch=0,
            grid=(B_pad // bm,),
            in_specs=[
                pl.BlockSpec((bm, D_IN), lambda i: (i, 0)),
                # Constant block index -> weights stay VMEM-resident, one fetch.
                pl.BlockSpec((D_IN, N1P), lambda i: (0, 0)),
                pl.BlockSpec((N1P, N2P), lambda i: (0, 0)),
                pl.BlockSpec((N2P, N3P), lambda i: (0, 0)),
            ],
            out_specs=pl.BlockSpec((bm, N3P), lambda i: (i, 0)),
        ),
        compiler_params=pltpu.CompilerParams(
            dimension_semantics=("parallel",),
            vmem_limit_bytes=48 * 1024 * 1024,
        ),
        cost_estimate=pl.CostEstimate(
            flops=flops, transcendentals=0, bytes_accessed=bytes_accessed
        ),
    )(x, w1p, w2p, w3p)

    return out_padded[:B, :N3]


def _reference_forward_bf16(x, w1p, w2p, w3p):
    """Pure-JAX reference with the identical bf16/f32 dtype pipeline."""
    xb = x.astype(jnp.bfloat16)
    m1 = jnp.dot(xb, w1p, preferred_element_type=jnp.float32)
    s1 = (m1 >= SPIKE_THRESHOLD).astype(jnp.bfloat16)
    m2 = jnp.dot(s1, w2p, preferred_element_type=jnp.float32)
    s2 = (m2 >= SPIKE_THRESHOLD).astype(jnp.bfloat16)
    m3 = jnp.dot(s2, w3p, preferred_element_type=jnp.float32)
    return (m3 >= SPIKE_THRESHOLD).astype(jnp.float32)[:, :N3]


def _reference_forward_f32(x, w1, w2, w3):
    """Exact-f32 reference (unpadded f32 weights), matching the PyTorch math."""
    xf = x.astype(jnp.float32)
    m1 = xf @ w1
    s1 = (m1 >= SPIKE_THRESHOLD).astype(jnp.float32)
    m2 = s1 @ w2
    s2 = (m2 >= SPIKE_THRESHOLD).astype(jnp.float32)
    m3 = s2 @ w3
    return (m3 >= SPIKE_THRESHOLD).astype(jnp.float32)


if __name__ == "__main__":
    key = jax.random.PRNGKey(0)
    kx, k1, k2, k3, kl = jax.random.split(key, 5)

    batch = 8  # small test batch (module default is 128)
    # MNIST-like input; in production the producer should emit bf16 directly
    # (the cast here just simulates that for the self-contained test).
    x = jax.random.uniform(kx, (batch, D_IN), dtype=jnp.float32)
    x_bf16 = x.astype(jnp.bfloat16)

    # Deterministic weight init, [in, out] layout (matches y = x @ W).
    w1 = jax.random.normal(k1, (D_IN, N1), dtype=jnp.float32) * 0.05
    w2 = jax.random.normal(k2, (N1, N2), dtype=jnp.float32) * 0.05
    w3 = jax.random.normal(k3, (N2, N3), dtype=jnp.float32) * 0.05

    # labels are unused by the forward pass itself (only by reward/plasticity).
    labels = jax.random.randint(kl, (batch,), 0, 10)

    w1p, w2p, w3p = prepare_params(w1, w2, w3)

    out = simple_linear_forward(x_bf16, w1p, w2p, w3p)
    out = jax.block_until_ready(out)
    assert out.shape == (batch, N3), out.shape
    out_f32 = out.astype(jnp.float32)

    # 1) Same-dtype-pipeline reference: should match up to accumulation-order
    #    ties at the hard threshold.
    ref_bf16 = _reference_forward_bf16(x_bf16, w1p, w2p, w3p)
    mismatch_bf16 = float(jnp.mean((out_f32 != ref_bf16).astype(jnp.float32)))
    assert mismatch_bf16 <= 0.01, f"bf16-ref spike mismatch rate: {mismatch_bf16}"

    # 2) Exact-f32 reference: bounds the bf16-weight/threshold divergence.
    ref_f32 = _reference_forward_f32(x, w1, w2, w3)
    mismatch_f32 = float(jnp.mean((out_f32 != ref_f32).astype(jnp.float32)))
    assert mismatch_f32 <= 0.02, f"f32-ref spike mismatch rate: {mismatch_f32}"

    print("KERNEL_OK")
</pallas_src>

<mosaic_0001>
module attributes {stable_mosaic.version = 11 : i64} {
  func.func @_stdp_mlp_kernel(%arg0: i32, %arg1: memref<8x784xbf16, #tpu.memory_space<vmem>>, %arg2: memref<784x512xbf16, #tpu.memory_space<vmem>>, %arg3: memref<512x256xbf16, #tpu.memory_space<vmem>>, %arg4: memref<256x128xbf16, #tpu.memory_space<vmem>>, %arg5: memref<8x128xbf16, #tpu.memory_space<vmem>>) attributes {dimension_semantics = [#tpu.dimension_semantics<parallel>], iteration_bounds = array<i64: 1>, scalar_prefetch = 0 : i64, scratch_operands = 0 : i64, tpu.core_type = #tpu.core_type<tc>, window_params = [{transform_indices = @transform_0, window_bounds = array<i64: 8, 784>}, {pipeline_mode = #tpu.pipeline_mode<synchronous>, transform_indices = @transform_1, window_bounds = array<i64: 784, 512>}, {pipeline_mode = #tpu.pipeline_mode<synchronous>, transform_indices = @transform_2, window_bounds = array<i64: 512, 256>}, {pipeline_mode = #tpu.pipeline_mode<synchronous>, transform_indices = @transform_3, window_bounds = array<i64: 256, 128>}, {transform_indices = @transform_4, window_bounds = array<i64: 8, 128>}]} {
    %c0 = arith.constant 0 : index
    %c0_0 = arith.constant 0 : index
    %0 = vector.load %arg1[%c0, %c0_0] : memref<8x784xbf16, #tpu.memory_space<vmem>>, vector<8x784xbf16>
    %c0_1 = arith.constant 0 : index
    %c0_2 = arith.constant 0 : index
    %1 = vector.load %arg2[%c0_1, %c0_2] : memref<784x512xbf16, #tpu.memory_space<vmem>>, vector<784x512xbf16>
    %cst = arith.constant dense<0.000000e+00> : vector<8x512xf32>
    %2 = tpu.matmul %0, %1, %cst {dimension_numbers = #tpu.dot_dimension_numbers<[1], [0], [0], [1], [0, 0, 1, 1], [], []>} : vector<8x784xbf16>, vector<784x512xbf16>, vector<8x512xf32> -> vector<8x512xf32>
    %cst_3 = arith.constant 1.000000e+00 : f32
    %3 = vector.broadcast %cst_3 : f32 to vector<8x512xf32>
    %4 = arith.cmpf oge, %2, %3 : vector<8x512xf32>
    %5 = arith.extui %4 : vector<8x512xi1> to vector<8x512xi32>
    %6 = arith.sitofp %5 : vector<8x512xi32> to vector<8x512xf32>
    %7 = arith.truncf %6 : vector<8x512xf32> to vector<8x512xbf16>
    %c0_4 = arith.constant 0 : index
    %c0_5 = arith.constant 0 : index
    %8 = vector.load %arg3[%c0_4, %c0_5] : memref<512x256xbf16, #tpu.memory_space<vmem>>, vector<512x256xbf16>
    %cst_6 = arith.constant dense<0.000000e+00> : vector<8x256xf32>
    %9 = tpu.matmul %7, %8, %cst_6 {dimension_numbers = #tpu.dot_dimension_numbers<[1], [0], [0], [1], [0, 0, 1, 1], [], []>} : vector<8x512xbf16>, vector<512x256xbf16>, vector<8x256xf32> -> vector<8x256xf32>
    %cst_7 = arith.constant 1.000000e+00 : f32
    %10 = vector.broadcast %cst_7 : f32 to vector<8x256xf32>
    %11 = arith.cmpf oge, %9, %10 : vector<8x256xf32>
    %12 = arith.extui %11 : vector<8x256xi1> to vector<8x256xi32>
    %13 = arith.sitofp %12 : vector<8x256xi32> to vector<8x256xf32>
    %14 = arith.truncf %13 : vector<8x256xf32> to vector<8x256xbf16>
    %c0_8 = arith.constant 0 : index
    %c0_9 = arith.constant 0 : index
    %15 = vector.load %arg4[%c0_8, %c0_9] : memref<256x128xbf16, #tpu.memory_space<vmem>>, vector<256x128xbf16>
    %cst_10 = arith.constant dense<0.000000e+00> : vector<8x128xf32>
    %16 = tpu.matmul %14, %15, %cst_10 {dimension_numbers = #tpu.dot_dimension_numbers<[1], [0], [0], [1], [0, 0, 1, 1], [], []>} : vector<8x256xbf16>, vector<256x128xbf16>, vector<8x128xf32> -> vector<8x128xf32>
    %cst_11 = arith.constant 1.000000e+00 : f32
    %17 = vector.broadcast %cst_11 : f32 to vector<8x128xf32>
    %18 = arith.cmpf oge, %16, %17 : vector<8x128xf32>
    %19 = arith.extui %18 : vector<8x128xi1> to vector<8x128xi32>
    %20 = arith.sitofp %19 : vector<8x128xi32> to vector<8x128xf32>
    %21 = arith.truncf %20 : vector<8x128xf32> to vector<8x128xbf16>
    %c0_12 = arith.constant 0 : index
    %c0_13 = arith.constant 0 : index
    %22 = vector.load %arg5[%c0_12, %c0_13] : memref<8x128xbf16, #tpu.memory_space<vmem>>, vector<8x128xbf16>
    tpu.vector_store %arg5[%c0_12, %c0_13], %21 {strides = array<i32>} : memref<8x128xbf16, #tpu.memory_space<vmem>>, vector<8x128xbf16>,
    return
  }
  func.func @transform_0(%arg0: i32) -> (i32, i32) {
    %c0_i32 = arith.constant 0 : i32
    %c0_i32_0 = arith.constant 0 : i32
    return %arg0, %c0_i32 : i32, i32
  }
  func.func @transform_1(%arg0: i32) -> (i32, i32) {
    %c0_i32 = arith.constant 0 : i32
    %c0_i32_0 = arith.constant 0 : i32
    %c0_i32_1 = arith.constant 0 : i32
    return %c0_i32, %c0_i32_0 : i32, i32
  }
  func.func @transform_2(%arg0: i32) -> (i32, i32) {
    %c0_i32 = arith.constant 0 : i32
    %c0_i32_0 = arith.constant 0 : i32
    %c0_i32_1 = arith.constant 0 : i32
    return %c0_i32, %c0_i32_0 : i32, i32
  }
  func.func @transform_3(%arg0: i32) -> (i32, i32) {
    %c0_i32 = arith.constant 0 : i32
    %c0_i32_0 = arith.constant 0 : i32
    %c0_i32_1 = arith.constant 0 : i32
    return %c0_i32, %c0_i32_0 : i32, i32
  }
  func.func @transform_4(%arg0: i32) -> (i32, i32) {
    %c0_i32 = arith.constant 0 : i32
    %c0_i32_0 = arith.constant 0 : i32
    return %arg0, %c0_i32 : i32, i32
  }
}

</mosaic_0001>

<bundles_post_ra>
// kernel: tpu_custom_call.1
= control target key start
LH: loop header
LB: loop body
LE: loop exit
PB: predicated region body
PF: predicated region fallthrough
CT: control target
= control target key end

     0   :  { %9 = vsyncpa [#allocation3], 0  ;;  %s3247_s0 = inlined_call_operand.hbm [shape: bf16[8,784], index: 0, kind: input, shape index: {}]   ;;  %s3248_s1 = inlined_call_operand.hbm [shape: bf16[784,512], index: 1, kind: input, shape index: {}]   ;;  %s3249_s2 = inlined_call_operand.hbm [shape: bf16[512,256], index: 2, kind: input, shape index: {}]   ;;  %s3250_s3 = inlined_call_operand.hbm [shape: bf16[256,128], index: 3, kind: input, shape index: {}]   ;;  %s3251_s4 = inlined_call_operand.hbm [shape: bf16[8,128], index: 4, kind: output, shape index: {}]  }
   0x1   :  { %10 = vsyncpa [#allocation6], 0 }
   0x2   :  { %11 = vsyncpa [#allocation9], 0 }
   0x3   :  { %12 = vsyncpa [#allocation4], 0  ;;  %s3149_s15 = smov [#allocation5]  }
   0x4   :  { %s28_s16 = sshll.u32 %s3149_s15, 4  ;;  %s29_s16 = int_to_ptr.vmem [resolvable:$true] %s28_s16 }
   0x5   :  { %s3049_s17 = scalar_lea.vmem %s29_s16, 25088  ;;  %p3054_p1 = scmp.lt.s32.totalorder %s29_s16, %s29_s16 }
   0x6   :  { %p3050_p0 = scmp.ne.s32.totalorder %s29_s16, %s3049_s17  ;;  %p3055_p2 = scmp.lt.s32.totalorder %s3049_s17, %s3049_s17 }
   0x8   :  { %p3056_p3 = por %p3055_p2, %p3054_p1 }
   0xa   :  { %p3057_p4 = pnand %p3056_p3, %p3050_p0 }
   0xc   :  { %3060 = shalt.err (!%p3057_p4)
}
   0xd   :  { %s3150_s18 = smov 256   ;;  %s3151_s19 = smov 16  }
   0xe   :  { %34 = dma.hbm_to_vmem [thread:$0]  %s3248_s1, 25088, %s29_s16, [#allocation6], %s3150_s18, %s3150_s18, %s3151_s19  }
   0xf   :  { %s3152_s22 = smov [#allocation2]   ;;  %s3153_s24 = smov [#allocation7]  }
  0x10   :  { %s19_s23 = sshll.u32 %s3152_s22, 4  ;;  %s40_s25 = sshll.u32 %s3153_s24, 4  ;;  %s20_s23 = int_to_ptr.vmem [resolvable:$true] %s19_s23  ;;  %s41_s25 = int_to_ptr.vmem [resolvable:$true] %s40_s25 }
  0x11   :  { %s3069_s26 = scalar_lea.vmem %s20_s23, 448  ;;  %p3074_p6 = scmp.lt.s32.totalorder %s20_s23, %s20_s23 }
  0x12   :  { %p3070_p5 = scmp.ne.s32.totalorder %s20_s23, %s3069_s26  ;;  %p3075_p7 = scmp.lt.s32.totalorder %s3069_s26, %s3069_s26 }
  0x14   :  { %p3076_p8 = por %p3075_p7, %p3074_p6 }
  0x16   :  { %p3077_p9 = pnand %p3076_p8, %p3070_p5 }
  0x18   :  { %3080 = shalt.err (!%p3077_p9)
}
  0x19   :  { %22 = dma.hbm_to_vmem [thread:$0]  %s3247_s0, 448, %s20_s23, [#allocation3]  }
  0x1a   :  { %s3089_s29 = scalar_lea.vmem %s41_s25, 8192  ;;  %p3094_p11 = scmp.lt.s32.totalorder %s41_s25, %s41_s25 }
  0x1b   :  { %p3090_p10 = scmp.ne.s32.totalorder %s41_s25, %s3089_s29  ;;  %p3095_p12 = scmp.lt.s32.totalorder %s3089_s29, %s3089_s29 }
  0x1d   :  { %p3096_p13 = por %p3095_p12, %p3094_p11 }
  0x1f   :  { %p3097_p0 = pnand %p3096_p13, %p3090_p10 }
  0x21   :  { %3100 = shalt.err (!%p3097_p0)
}
  0x22   :  { %s3154_s1 = smov 128   ;;  %s3155_s30 = smov 8  }
  0x23   :  { %46 = dma.hbm_to_vmem [thread:$0]  %s3249_s2, 8192, %s41_s25, [#allocation6], %s3154_s1, %s3154_s1, %s3155_s30  }
  0x24   :  { %s3156_s7 = smov [#allocation8]  }
  0x25   :  { %s52_s8 = sshll.u32 %s3156_s7, 4  ;;  %s53_s8 = int_to_ptr.vmem [resolvable:$true] %s52_s8 }
  0x26   :  { %s3109_s9 = scalar_lea.vmem %s53_s8, 2048  ;;  %p3114_p2 = scmp.lt.s32.totalorder %s53_s8, %s53_s8 }
  0x27   :  { %p3110_p1 = scmp.ne.s32.totalorder %s53_s8, %s3109_s9  ;;  %p3115_p3 = scmp.lt.s32.totalorder %s3109_s9, %s3109_s9 }
  0x29   :  { %p3116_p4 = por %p3115_p3, %p3114_p2 }
  0x2b   :  { %p3117_p5 = pnand %p3116_p4, %p3110_p1 }
  0x2d   :  { %3120 = shalt.err (!%p3117_p5)
}
  0x2e   :  { %s3157_s0 = smov 64   ;;  %s3158_s10 = smov 4  }
  0x2f   :  { %58 = dma.hbm_to_vmem [thread:$0]  %s3250_s3, 2048, %s53_s8, [#allocation9], %s3157_s0, %s3157_s0, %s3158_s10  }
  0x30   :  { %3141 = dma.done.wait [#allocation3], 448  }
  0x31   :  { %3142 = vsyncadd [#allocation3], 4294966848 }
  0x32   :  { %3143 = dma.done.wait [#allocation6], 33280  }
  0x33   :  { %3144 = vsyncadd [#allocation6], 4294934016 }
  0x34   :  { %3145 = dma.done.wait [#allocation9], 2048  }
  0x35   :  { %3146 = vsyncadd [#allocation9], 4294965248  ;;  %v2628_v0 = vld [vmem:[#allocation5 + $0xe4] ss:$16 sps:$4 sm:$0xff]   ;;  %v2632_v2 = vld [vmem:[#allocation5 + $0xe0] ss:$16 sps:$4 sm:$0xff]  }
  0x36   :  { %v2630_v1 = vld [vmem:[#allocation5 + $0x2e4] ss:$16 sps:$4 sm:$0xff]   ;;  %1280 = vmatprep.subr.bf16.mxu0 %v2628_v0  ;;  %v2633_v3 = vld [vmem:[#allocation5 + $0x2e0] ss:$16 sps:$4 sm:$0xff]   ;;  %vm1276_vm0 = vcmask 130048   ;;  %s3161_s2 = smov [#allocation10]  }
  0x37   :  { %1321 = vmatprep.subr.bf16.mxu1 %v2630_v1  ;;  %v2634_v4 = vld [vmem:[#allocation5 + $0xc4] ss:$16 sps:$4 sm:$0xff]   ;;  %1281 = vmatpush1.bf16.msra.mxu0 %v2632_v2  ;;  %v2638_v6 = vld [vmem:[#allocation5 + $0xc0] ss:$16 sps:$4 sm:$0xff]   ;;  %s2277_s3 = sshll.u32 %s3161_s2, 4  ;;  %s2278_s3 = int_to_ptr.vmem [resolvable:$true] %s2277_s3 }
  0x38   :  { %1322 = vmatpush1.bf16.msra.mxu1 %v2633_v3  ;;  %v2636_v5 = vld [vmem:[#allocation5 + $0x2c4] ss:$16 sps:$4 sm:$0xff]   ;;  %1282 = vmatprep.subr.bf16.mxu0 %v2634_v4  ;;  %v2639_v7 = vld [vmem:[#allocation5 + $0x2c0] ss:$16 sps:$4 sm:$0xff]   ;;  %s3121_s13 = scalar_lea.vmem %s2278_s3, 64  ;;  %p3126_p7 = scmp.lt.s32.totalorder %s2278_s3, %s2278_s3 }
  0x39   :  { %1323 = vmatprep.subr.bf16.mxu1 %v2636_v5  ;;  %v2640_v8 = vld [vmem:[#allocation5 + $0xa4] ss:$16 sps:$4 sm:$0xff]   ;;  %v2644_v10 = vld [vmem:[#allocation5 + $0xa0] ss:$16 sps:$4 sm:$0xff]   ;;  %p3122_p6 = scmp.ne.s32.totalorder %s2278_s3, %s3121_s13  ;;  %p3127_p8 = scmp.lt.s32.totalorder %s3121_s13, %s3121_s13 }
  0x3a   :  { %v2642_v9 = vld [vmem:[#allocation5 + $0x2a4] ss:$16 sps:$4 sm:$0xff]   ;;  %v2645_v11 = vld [vmem:[#allocation5 + $0x2a0] ss:$16 sps:$4 sm:$0xff]  }
  0x3b   :  { %1283 = vmatpush1.bf16.msra.mxu0 %v2638_v6  ;;  %v2646_v12 = vld [vmem:[#allocation5 + $0x84] ss:$16 sps:$4 sm:$0xff]   ;;  %v2650_v14 = vld [vmem:[#allocation5 + $0x80] ss:$16 sps:$4 sm:$0xff]   ;;  %p3128_p9 = por %p3127_p8, %p3126_p7 }
  0x3c   :  { %1324 = vmatpush1.bf16.msra.mxu1 %v2639_v7  ;;  %1284 = vmatprep.subr.bf16.mxu0 %v2640_v8  ;;  %v2648_v13 = vld [vmem:[#allocation5 + $0x284] ss:$16 sps:$4 sm:$0xff]   ;;  %v2651_v15 = vld [vmem:[#allocation5 + $0x280] ss:$16 sps:$4 sm:$0xff]  }
  0x3d   :  { %1325 = vmatprep.subr.bf16.mxu1 %v2642_v9  ;;  %v2652_v16 = vld [vmem:[#allocation5 + $0x64] ss:$16 sps:$4 sm:$0xff]   ;;  %v2656_v18 = vld [vmem:[#allocation5 + $0x60] ss:$16 sps:$4 sm:$0xff]   ;;  %p3129_p10 = pnand %p3128_p9, %p3122_p6 }
  0x3e   :  { %v2654_v17 = vld [vmem:[#allocation5 + $0x264] ss:$16 sps:$4 sm:$0xff]   ;;  %v2657_v19 = vld [vmem:[#allocation5 + $0x260] ss:$16 sps:$4 sm:$0xff]  }
  0x3f   :  { %1285 = vmatpush1.bf16.msra.mxu0 %v2644_v10  ;;  %v2658_v20 = vld [vmem:[#allocation5 + $0x44] ss:$16 sps:$4 sm:$0xff]   ;;  %v2662_v22 = vld [vmem:[#allocation5 + $0x40] ss:$16 sps:$4 sm:$0xff]  }
  0x40   :  { %1326 = vmatpush1.bf16.msra.mxu1 %v2645_v11  ;;  %1286 = vmatprep.subr.bf16.mxu0 %v2646_v12  ;;  %v2660_v21 = vld [vmem:[#allocation5 + $0x244] ss:$16 sps:$4 sm:$0xff]   ;;  %v2663_v23 = vld [vmem:[#allocation5 + $0x240] ss:$16 sps:$4 sm:$0xff]   ;;  %v2739_v11 = vld [vmem:[#allocation5 + $0xec] ss:$16 sps:$4 sm:$0xff]  }
  0x41   :  { %1327 = vmatprep.subr.bf16.mxu1 %v2648_v13  ;;  %v2664_v24 = vld [vmem:[#allocation5 + $0x24] ss:$16 sps:$4 sm:$0xff]   ;;  %v2668_v26 = vld [vmem:[#allocation5 + $0x20] ss:$16 sps:$4 sm:$0xff]   ;;  %v3159_v13 = vmov 0  }
  0x42   :  { %v2666_v25 = vld [vmem:[#allocation5 + $0x224] ss:$16 sps:$4 sm:$0xff]   ;;  %v2669_v27 = vld [vmem:[#allocation5 + $0x220] ss:$16 sps:$4 sm:$0xff]  }
  0x43   :  { %1287 = vmatpush1.bf16.msra.mxu0 %v2650_v14  ;;  %v2670_v28 = vld [vmem:[#allocation5 + $0x4] ss:$16 sps:$4 sm:$0xff]   ;;  %v2674_v30 = vld [vmem:[#allocation5] ss:$16 sps:$4 sm:$0xff]  }
  0x44   :  { %1328 = vmatpush1.bf16.msra.mxu1 %v2651_v15  ;;  %1288 = vmatprep.subr.bf16.mxu0 %v2652_v16  ;;  %v2672_v29 = vld [vmem:[#allocation5 + $0x204] ss:$16 sps:$4 sm:$0xff]   ;;  %v2675_v31 = vld [vmem:[#allocation5 + $0x200] ss:$16 sps:$4 sm:$0xff]   ;;  %v2737_v15 = vld [vmem:[#allocation5 + $0xe8] ss:$16 sps:$4 sm:$0xff]  }
  0x45   :  { %1329 = vmatprep.subr.bf16.mxu1 %v2654_v17  ;;  %v2676_v32 = vld [vmem:[#allocation5 + $0x1e4] ss:$16 sps:$4 sm:$0xff]   ;;  %v2680_v34 = vld [vmem:[#allocation5 + $0x1e0] ss:$16 sps:$4 sm:$0xff]   ;;  %v3213_v17 = vld [vmem:[#allocation2 + $0x18] ss:$0 sps:$4 sm:$0xff]  }
  0x46   :  { %v2678_v33 = vld [vmem:[#allocation5 + $0x3e4] ss:$16 sps:$4 sm:$0xff]   ;;  %v2681_v35 = vld [vmem:[#allocation5 + $0x3e0] ss:$16 sps:$4 sm:$0xff]  }
  0x47   :  { %1289 = vmatpush1.bf16.msra.mxu0 %v2656_v18  ;;  %v2682_v36 = vld [vmem:[#allocation5 + $0x1c4] ss:$16 sps:$4 sm:$0xff]   ;;  %v2686_v38 = vld [vmem:[#allocation5 + $0x1c0] ss:$16 sps:$4 sm:$0xff]   ;;  %v2746_v18 = vld [vmem:[#allocation5 + $0xcc] ss:$16 sps:$4 sm:$0xff]  }
  0x48   :  { %1330 = vmatpush1.bf16.msra.mxu1 %v2657_v19  ;;  %1290 = vmatprep.subr.bf16.mxu0 %v2658_v20  ;;  %v2684_v37 = vld [vmem:[#allocation5 + $0x3c4] ss:$16 sps:$4 sm:$0xff]   ;;  %v2687_v39 = vld [vmem:[#allocation5 + $0x3c0] ss:$16 sps:$4 sm:$0xff]   ;;  %v2744_v20 = vld [vmem:[#allocation5 + $0xc8] ss:$16 sps:$4 sm:$0xff]  }
  0x49   :  { %1331 = vmatprep.subr.bf16.mxu1 %v2660_v21  ;;  %v2688_v40 = vld [vmem:[#allocation5 + $0x1a4] ss:$16 sps:$4 sm:$0xff]   ;;  %v2692_v42 = vld [vmem:[#allocation5 + $0x1a0] ss:$16 sps:$4 sm:$0xff]  }
  0x4a   :  { %v2690_v41 = vld [vmem:[#allocation5 + $0x3a4] ss:$16 sps:$4 sm:$0xff]   ;;  %v2693_v43 = vld [vmem:[#allocation5 + $0x3a0] ss:$16 sps:$4 sm:$0xff]  }
  0x4b   :  { %1291 = vmatpush1.bf16.msra.mxu0 %v2662_v22  ;;  %v2694_v44 = vld [vmem:[#allocation5 + $0x184] ss:$16 sps:$4 sm:$0xff]   ;;  %v73_v48 = vld [vmem:[#allocation2 + $0x8] sm:$0xff] }
  0x4c   :  { %1332 = vmatpush1.bf16.msra.mxu1 %v2663_v23  ;;  %1292 = vmatprep.subr.bf16.mxu0 %v2664_v24  ;;  %v2696_v45 = vld [vmem:[#allocation5 + $0x384] ss:$16 sps:$4 sm:$0xff]   ;;  %v2698_v49 = vld [vmem:[#allocation5 + $0x180] ss:$16 sps:$4 sm:$0xff]   ;;  %v3202_v51 = vcombine.high %v73_v48, %v73_v48  ;;  %v3208_v7 = vcombine.low %v73_v48, %v73_v48  ;;  %v2752_v22 = vld [vmem:[#allocation5 + $0xac] ss:$16 sps:$4 sm:$0xff]  }
  0x4d   :  { %1333 = vmatprep.subr.bf16.mxu1 %v2666_v25  ;;  %v72_v46 = vld [vmem:[#allocation2] sm:$0xff]  ;;  %v2699_v50 = vld [vmem:[#allocation5 + $0x380] ss:$16 sps:$4 sm:$0xff]   ;;  %v2788_v48 = vld [vmem:[#allocation5 + $0x1ec] ss:$16 sps:$4 sm:$0xff]  }
  0x4e   :  { %v3200_v47 = vcombine.high %v72_v46, %v72_v46  ;;  %v2700_v52 = vld [vmem:[#allocation5 + $0x164] ss:$16 sps:$4 sm:$0xff]   ;;  %1353 = vmatprep.mubr.bf16.mxu1 %v3202_v51  ;;  %v2704_v54 = vld [vmem:[#allocation5 + $0x160] ss:$16 sps:$4 sm:$0xff]   ;;  %v3206_v6 = vcombine.low %v72_v46, %v72_v46  ;;  %v2750_v24 = vld [vmem:[#allocation5 + $0xa8] ss:$16 sps:$4 sm:$0xff]  }
  0x4f   :  { %1293 = vmatpush1.bf16.msra.mxu0 %v2668_v26  ;;  %v2702_v53 = vld [vmem:[#allocation5 + $0x364] ss:$16 sps:$4 sm:$0xff]   ;;  %v2705_v55 = vld [vmem:[#allocation5 + $0x360] ss:$16 sps:$4 sm:$0xff]   ;;  %v2758_v26 = vld [vmem:[#allocation5 + $0x8c] ss:$16 sps:$4 sm:$0xff]  }
  0x50   :  { %1334 = vmatpush1.bf16.msra.mxu1 %v2669_v27  ;;  %1294 = vmatprep.subr.bf16.mxu0 %v2670_v28  ;;  %v2706_v56 = vld [vmem:[#allocation5 + $0x144] ss:$16 sps:$4 sm:$0xff]   ;;  %v2710_v58 = vld [vmem:[#allocation5 + $0x140] ss:$16 sps:$4 sm:$0xff]   ;;  %v2756_v28 = vld [vmem:[#allocation5 + $0x88] ss:$16 sps:$4 sm:$0xff]  }
  0x51   :  { %1335 = vmatprep.subr.bf16.mxu1 %v2672_v29  ;;  %1312 = vmatprep.mubr.bf16.mxu0 %v3200_v47  ;;  %v2708_v57 = vld [vmem:[#allocation5 + $0x344] ss:$16 sps:$4 sm:$0xff]   ;;  %v2711_v59 = vld [vmem:[#allocation5 + $0x340] ss:$16 sps:$4 sm:$0xff]   ;;  %v2780_v46 = vld [vmem:[#allocation5 + $0x8] ss:$16 sps:$4 sm:$0xff]  }
  0x52   :  { %v2712_v60 = vld [vmem:[#allocation5 + $0x124] ss:$16 sps:$4 sm:$0xff]   ;;  %v2716_v62 = vld [vmem:[#allocation5 + $0x120] ss:$16 sps:$4 sm:$0xff]  }
  0x53   :  { %1295 = vmatpush1.bf16.msra.mxu0 %v2674_v30  ;;  %v2714_v61 = vld [vmem:[#allocation5 + $0x324] ss:$16 sps:$4 sm:$0xff]   ;;  %v2717_v63 = vld [vmem:[#allocation5 + $0x320] ss:$16 sps:$4 sm:$0xff]   ;;  %v2764_v30 = vld [vmem:[#allocation5 + $0x6c] ss:$16 sps:$4 sm:$0xff]  }
  0x54   :  { %1336 = vmatpush1.bf16.msra.mxu1 %v2675_v31  ;;  %1296 = vmatprep.subr.bf16.mxu0 %v2676_v32  ;;  %v2718_v0 = vld [vmem:[#allocation5 + $0x104] ss:$16 sps:$4 sm:$0xff]   ;;  %v2722_v2 = vld [vmem:[#allocation5 + $0x100] ss:$16 sps:$4 sm:$0xff]  }
  0x55   :  { %1337 = vmatprep.subr.bf16.mxu1 %v2678_v33  ;;  %v2720_v1 = vld [vmem:[#allocation5 + $0x304] ss:$16 sps:$4 sm:$0xff]   ;;  %v2723_v3 = vld [vmem:[#allocation5 + $0x300] ss:$16 sps:$4 sm:$0xff]  }
  0x56   :  { %v2730_v4 = vld [vmem:[#allocation5 + $0x4e4] ss:$16 sps:$4 sm:$0xff]   ;;  %v2728_v8 = vld [vmem:[#allocation5 + $0x4e0] ss:$16 sps:$4 sm:$0xff]  }
  0x57   :  { %1297 = vmatpush2.bf16.msra.mxu0 %v2680_v34  ;;  %v2733_v5 = vld [vmem:[#allocation5 + $0x604] ss:$16 sps:$4 sm:$0xff]   ;;  %v2731_v9 = vld [vmem:[#allocation5 + $0x600] ss:$16 sps:$4 sm:$0xff]   ;;  %v2762_v34 = vld [vmem:[#allocation5 + $0x68] ss:$16 sps:$4 sm:$0xff]  }
  0x58   :  { %1338 = vmatpush2.bf16.msra.mxu1 %v2681_v35  ;;  %1298 = vmatprep.subr.bf16.mxu0 %v2682_v36  ;;  %v2736_v10 = vld [vmem:[#allocation5 + $0x4c4] ss:$16 sps:$4 sm:$0xff]   ;;  %v2734_v12 = vld [vmem:[#allocation5 + $0x4c0] ss:$16 sps:$4 sm:$0xff]   ;;  %v2770_v36 = vld [vmem:[#allocation5 + $0x4c] ss:$16 sps:$4 sm:$0xff]  }
  0x59   :  { %1339 = vmatprep.subr.bf16.mxu1 %v2684_v37  ;;  %v2742_v14 = vld [vmem:[#allocation5 + $0x4a4] ss:$16 sps:$4 sm:$0xff]   ;;  %v2740_v16 = vld [vmem:[#allocation5 + $0x4a0] ss:$16 sps:$4 sm:$0xff]  }
  0x5a   :  { %v2749_v19 = vld [vmem:[#allocation5 + $0x484] ss:$16 sps:$4 sm:$0xff]   ;;  %v2747_v21 = vld [vmem:[#allocation5 + $0x480] ss:$16 sps:$4 sm:$0xff]  }
  0x5b   :  { %1299 = vmatpush2.bf16.msra.mxu0 %v2686_v38  ;;  %v2755_v23 = vld [vmem:[#allocation5 + $0x464] ss:$16 sps:$4 sm:$0xff]   ;;  %v2753_v25 = vld [vmem:[#allocation5 + $0x460] ss:$16 sps:$4 sm:$0xff]   ;;  %v2768_v38 = vld [vmem:[#allocation5 + $0x48] ss:$16 sps:$4 sm:$0xff]  }
  0x5c   :  { %1340 = vmatpush2.bf16.msra.mxu1 %v2687_v39  ;;  %1300 = vmatprep.subr.bf16.mxu0 %v2688_v40  ;;  %v2761_v27 = vld [vmem:[#allocation5 + $0x444] ss:$16 sps:$4 sm:$0xff]   ;;  %v2759_v29 = vld [vmem:[#allocation5 + $0x440] ss:$16 sps:$4 sm:$0xff]   ;;  %v2776_v40 = vld [vmem:[#allocation5 + $0x2c] ss:$16 sps:$4 sm:$0xff]  }
  0x5d   :  { %1341 = vmatprep.subr.bf16.mxu1 %v2690_v41  ;;  %v2767_v31 = vld [vmem:[#allocation5 + $0x424] ss:$16 sps:$4 sm:$0xff]   ;;  %v2765_v35 = vld [vmem:[#allocation5 + $0x420] ss:$16 sps:$4 sm:$0xff]  }
  0x5e   :  { %v3218_v32 = vld [vmem:[#allocation2 + $0x10] sm:$0xff]  ;;  %v2771_v39 = vld [vmem:[#allocation5 + $0x400] ss:$16 sps:$4 sm:$0xff]  }
  0x5f   :  { %1301 = vmatpush2.bf16.msra.mxu0 %v2692_v42  ;;  %v3222_v33 = vcombine.high %v3218_v32, %v3218_v32  ;;  %v2773_v37 = vld [vmem:[#allocation5 + $0x404] ss:$16 sps:$4 sm:$0xff]   ;;  %v2774_v42 = vld [vmem:[#allocation5 + $0x28] ss:$16 sps:$4 sm:$0xff]  }
  0x60   :  { %1342 = vmatpush2.bf16.msra.mxu1 %v2693_v43  ;;  %1302 = vmatprep.subr.bf16.mxu0 %v2694_v44  ;;  %v2779_v41 = vld [vmem:[#allocation5 + $0x5e4] ss:$16 sps:$4 sm:$0xff]   ;;  %v2777_v43 = vld [vmem:[#allocation5 + $0x5e0] ss:$16 sps:$4 sm:$0xff]   ;;  %v2782_v44 = vld [vmem:[#allocation5 + $0xc] ss:$16 sps:$4 sm:$0xff]  }
  0x61   :  { %1343 = vmatprep.subr.bf16.mxu1 %v2696_v45  ;;  %v2785_v45 = vld [vmem:[#allocation5 + $0x5c4] ss:$16 sps:$4 sm:$0xff]  }
  0x63   :  { %1303 = vmatpush2.bf16.msra.mxu0 %v2698_v49  ;;  %v2791_v49 = vld [vmem:[#allocation5 + $0x5a4] ss:$16 sps:$4 sm:$0xff]  }
  0x64   :  { %1344 = vmatpush2.bf16.msra.mxu1 %v2699_v50  ;;  %1304 = vmatprep.subr.bf16.mxu0 %v2700_v52  ;;  %v2786_v50 = vld [vmem:[#allocation5 + $0x1e8] ss:$16 sps:$4 sm:$0xff]   ;;  %v2789_v52 = vld [vmem:[#allocation5 + $0x5a0] ss:$16 sps:$4 sm:$0xff]  }
  0x65   :  { %1345 = vmatprep.subr.bf16.mxu1 %v2702_v53  ;;  %v2794_v53 = vld [vmem:[#allocation5 + $0x1cc] ss:$16 sps:$4 sm:$0xff]  }
  0x67   :  { %1305 = vmatpush2.bf16.msra.mxu0 %v2704_v54  ;;  %v2797_v54 = vld [vmem:[#allocation5 + $0x584] ss:$16 sps:$4 sm:$0xff]  }
  0x68   :  { %1346 = vmatpush2.bf16.msra.mxu1 %v2705_v55  ;;  %1306 = vmatprep.subr.bf16.mxu0 %v2706_v56  ;;  %v2792_v55 = vld [vmem:[#allocation5 + $0x1c8] ss:$16 sps:$4 sm:$0xff]   ;;  %v2795_v56 = vld [vmem:[#allocation5 + $0x580] ss:$16 sps:$4 sm:$0xff]  }
  0x69   :  { %1347 = vmatprep.subr.bf16.mxu1 %v2708_v57  ;;  %v2800_v57 = vld [vmem:[#allocation5 + $0x1ac] ss:$16 sps:$4 sm:$0xff]  }
  0x6b   :  { %1307 = vmatpush2.bf16.msra.mxu0 %v2710_v58  ;;  %v2803_v58 = vld [vmem:[#allocation5 + $0x564] ss:$16 sps:$4 sm:$0xff]  }
  0x6c   :  { %1348 = vmatpush2.bf16.msra.mxu1 %v2711_v59  ;;  %1308 = vmatprep.subr.bf16.mxu0 %v2712_v60  ;;  %v2798_v59 = vld [vmem:[#allocation5 + $0x1a8] ss:$16 sps:$4 sm:$0xff]   ;;  %v2801_v60 = vld [vmem:[#allocation5 + $0x560] ss:$16 sps:$4 sm:$0xff]  }
  0x6d   :  { %1349 = vmatprep.subr.bf16.mxu1 %v2714_v61  ;;  %v2806_v61 = vld [vmem:[#allocation5 + $0x18c] ss:$16 sps:$4 sm:$0xff]  }
  0x6f   :  { %1309 = vmatpush2.bf16.msra.mxu0 %v2716_v62  ;;  %v2809_v62 = vld [vmem:[#allocation5 + $0x544] ss:$16 sps:$4 sm:$0xff]  }
  0x70   :  { %1350 = vmatpush2.bf16.msra.mxu1 %v2717_v63  ;;  %1310 = vmatprep.subr.bf16.mxu0 %v2718_v0  ;;  %v2804_v63 = vld [vmem:[#allocation5 + $0x188] ss:$16 sps:$4 sm:$0xff]   ;;  %v2807_v0 = vld [vmem:[#allocation5 + $0x540] ss:$16 sps:$4 sm:$0xff]  }
  0x71   :  { %1351 = vmatprep.subr.bf16.mxu1 %v2720_v1  ;;  %v2812_v1 = vld [vmem:[#allocation5 + $0x16c] ss:$16 sps:$4 sm:$0xff]  }
  0x73   :  { %1311 = vmatpush2.bf16.msra.mxu0 %v2722_v2  ;;  %v2815_v2 = vld [vmem:[#allocation5 + $0x524] ss:$16 sps:$4 sm:$0xff]  }
  0x74   :  { %1352 = vmatpush2.bf16.msra.mxu1 %v2723_v3  ;;  %1362 = vmatprep.subr.bf16.mxu0 %v2730_v4  ;;  %v2810_v3 = vld [vmem:[#allocation5 + $0x168] ss:$16 sps:$4 sm:$0xff]   ;;  %v2813_v4 = vld [vmem:[#allocation5 + $0x520] ss:$16 sps:$4 sm:$0xff]  }
  0x75   :  { %1417 = vmatprep.subr.bf16.mxu1 %v2733_v5  ;;  %v2818_v5 = vld [vmem:[#allocation5 + $0x14c] ss:$16 sps:$4 sm:$0xff]  }
  0x76   :  { %1313 = vmatmul.mubr.bf16.vlgmr.msra.gmra.mxu0 %v3206_v6 }
  0x77   :  { %1354 = vmatmul.mubr.bf16.vlgmr.msra.gmra.mxu1 %v3208_v7  ;;  %1363 = vmatpush1.bf16.msra.mxu0 %v2728_v8  ;;  %v2821_v8 = vld [vmem:[#allocation5 + $0x504] ss:$16 sps:$4 sm:$0xff]  }
  0x78   :  { %1418 = vmatpush1.bf16.msra.mxu1 %v2731_v9  ;;  %1364 = vmatprep.subr.bf16.mxu0 %v2736_v10  ;;  %v2816_v9 = vld [vmem:[#allocation5 + $0x148] ss:$16 sps:$4 sm:$0xff]   ;;  %v2819_v10 = vld [vmem:[#allocation5 + $0x500] ss:$16 sps:$4 sm:$0xff]  }
  0x79   :  { %1435 = vmatprep.mubr.bf16.mxu1 %v3159_v13  ;;  %1444 = vmatprep.subr.bf16.mxu1 %v2739_v11  ;;  %v2826_v11 = vld [vmem:[#allocation5 + $0x12c] ss:$16 sps:$4 sm:$0xff]  }
  0x7a   :  { %1394 = vmatprep.mubr.bf16.mxu0 %v3222_v33 }
  0x7b   :  { %1365 = vmatpush1.bf16.msra.mxu0 %v2734_v12  ;;  %v2829_v12 = vld [vmem:[#allocation5 + $0x2ec] ss:$16 sps:$4 sm:$0xff]  }
  0x7c   :  { %1366 = vmatprep.subr.bf16.mxu0 %v2742_v14  ;;  %v3227_v14 = vcombine.low %v3218_v32, %v3218_v32  ;;  %v2848_v32 = vld [vmem:[#allocation5 + $0x4a8] ss:$16 sps:$4 sm:$0xff]  }
  0x7f   :  { %2491 = vmatmul.mubr.msk.bf16.vlgmr.msra.gmra.mxu1 %vm1276_vm0, %v3213_v17  ;;  %1367 = vmatpush1.bf16.msra.mxu0 %v2740_v16  ;;  %v2827_v16 = vld [vmem:[#allocation5 + $0x2e8] ss:$16 sps:$4 sm:$0xff]  }
  0x80   :  { %1445 = vmatpush1.bf16.msra.mxu1 %v2737_v15  ;;  %1368 = vmatprep.subr.bf16.mxu0 %v2749_v19  ;;  %v2824_v15 = vld [vmem:[#allocation5 + $0x128] ss:$16 sps:$4 sm:$0xff]   ;;  %v2835_v19 = vld [vmem:[#allocation5 + $0x2cc] ss:$16 sps:$4 sm:$0xff]  }
  0x81   :  { %1446 = vmatprep.subr.bf16.mxu1 %v2746_v18  ;;  %1476 = vmatprep.mubr.bf16.mxu1 %v3200_v47  ;;  %v2783_v47 = vld [vmem:[#allocation5 + $0x5c0] ss:$16 sps:$4 sm:$0xff]   ;;  %v2832_v18 = vld [vmem:[#allocation5 + $0x10c] ss:$16 sps:$4 sm:$0xff]  }
  0x83   :  { %1369 = vmatpush1.bf16.msra.mxu0 %v2747_v21  ;;  %v2833_v21 = vld [vmem:[#allocation5 + $0x2c8] ss:$16 sps:$4 sm:$0xff]  }
  0x84   :  { %1447 = vmatpush1.bf16.msra.mxu1 %v2744_v20  ;;  %1370 = vmatprep.subr.bf16.mxu0 %v2755_v23  ;;  %v2830_v20 = vld [vmem:[#allocation5 + $0x108] ss:$16 sps:$4 sm:$0xff]   ;;  %v2841_v23 = vld [vmem:[#allocation5 + $0x2ac] ss:$16 sps:$4 sm:$0xff]  }
  0x85   :  { %1448 = vmatprep.subr.bf16.mxu1 %v2752_v22  ;;  %v2838_v22 = vld [vmem:[#allocation5 + $0x4ec] ss:$16 sps:$4 sm:$0xff]  }
  0x87   :  { %1371 = vmatpush1.bf16.msra.mxu0 %v2753_v25  ;;  %v2839_v25 = vld [vmem:[#allocation5 + $0x2a8] ss:$16 sps:$4 sm:$0xff]  }
  0x88   :  { %1449 = vmatpush1.bf16.msra.mxu1 %v2750_v24  ;;  %1372 = vmatprep.subr.bf16.mxu0 %v2761_v27  ;;  %v2836_v24 = vld [vmem:[#allocation5 + $0x4e8] ss:$16 sps:$4 sm:$0xff]   ;;  %v2847_v27 = vld [vmem:[#allocation5 + $0x28c] ss:$16 sps:$4 sm:$0xff]  }
  0x89   :  { %1450 = vmatprep.subr.bf16.mxu1 %v2758_v26  ;;  %v2844_v26 = vld [vmem:[#allocation5 + $0x4cc] ss:$16 sps:$4 sm:$0xff]  }
  0x8b   :  { %1373 = vmatpush1.bf16.msra.mxu0 %v2759_v29  ;;  %v2845_v29 = vld [vmem:[#allocation5 + $0x288] ss:$16 sps:$4 sm:$0xff]  }
  0x8c   :  { %1451 = vmatpush1.bf16.msra.mxu1 %v2756_v28  ;;  %1374 = vmatprep.subr.bf16.mxu0 %v2767_v31  ;;  %v2842_v28 = vld [vmem:[#allocation5 + $0x4c8] ss:$16 sps:$4 sm:$0xff]   ;;  %v2853_v31 = vld [vmem:[#allocation5 + $0x26c] ss:$16 sps:$4 sm:$0xff]  }
  0x8d   :  { %1452 = vmatprep.subr.bf16.mxu1 %v2764_v30  ;;  %v2850_v30 = vld [vmem:[#allocation5 + $0x4ac] ss:$16 sps:$4 sm:$0xff]  }
  0x8f   :  { %1375 = vmatpush1.bf16.msra.mxu0 %v2765_v35  ;;  %v2859_v35 = vld [vmem:[#allocation5 + $0x24c] ss:$16 sps:$4 sm:$0xff]  }
  0x90   :  { %1453 = vmatpush1.bf16.msra.mxu1 %v2762_v34  ;;  %1376 = vmatprep.subr.bf16.mxu0 %v2773_v37  ;;  %v2856_v34 = vld [vmem:[#allocation5 + $0x48c] ss:$16 sps:$4 sm:$0xff]  }
  0x91   :  { %1454 = vmatprep.subr.bf16.mxu1 %v2770_v36  ;;  %v2854_v36 = vld [vmem:[#allocation5 + $0x488] ss:$16 sps:$4 sm:$0xff]   ;;  %v2862_v37 = vld [vmem:[#allocation5 + $0x46c] ss:$16 sps:$4 sm:$0xff]  }
  0x93   :  { %1377 = vmatpush1.bf16.msra.mxu0 %v2771_v39  ;;  %v2860_v39 = vld [vmem:[#allocation5 + $0x468] ss:$16 sps:$4 sm:$0xff]  }
  0x94   :  { %1455 = vmatpush1.bf16.msra.mxu1 %v2768_v38  ;;  %1378 = vmatprep.subr.bf16.mxu0 %v2779_v41  ;;  %v2865_v38 = vld [vmem:[#allocation5 + $0x22c] ss:$16 sps:$4 sm:$0xff]  }
  0x95   :  { %1456 = vmatprep.subr.bf16.mxu1 %v2776_v40  ;;  %v2863_v40 = vld [vmem:[#allocation5 + $0x228] ss:$16 sps:$4 sm:$0xff]   ;;  %v2871_v41 = vld [vmem:[#allocation5 + $0x20c] ss:$16 sps:$4 sm:$0xff]  }
  0x97   :  { %1379 = vmatpush2.bf16.msra.mxu0 %v2777_v43  ;;  %v2869_v43 = vld [vmem:[#allocation5 + $0x208] ss:$16 sps:$4 sm:$0xff]  }
  0x98   :  { %1457 = vmatpush1.bf16.msra.mxu1 %v2774_v42  ;;  %1380 = vmatprep.subr.bf16.mxu0 %v2785_v45  ;;  %v2866_v42 = vld [vmem:[#allocation5 + $0x448] ss:$16 sps:$4 sm:$0xff]   ;;  %v2877_v45 = vld [vmem:[#allocation5 + $0x3ec] ss:$16 sps:$4 sm:$0xff]  }
  0x99   :  { %1458 = vmatprep.subr.bf16.mxu1 %v2782_v44  ;;  %v2874_v44 = vld [vmem:[#allocation5 + $0x42c] ss:$16 sps:$4 sm:$0xff]  }
  0x9b   :  { %1381 = vmatpush2.bf16.msra.mxu0 %v2783_v47  ;;  %v2875_v47 = vld [vmem:[#allocation5 + $0x3e8] ss:$16 sps:$4 sm:$0xff]  }
  0x9c   :  { %1459 = vmatpush1.bf16.msra.mxu1 %v2780_v46  ;;  %1382 = vmatprep.subr.bf16.mxu0 %v2791_v49  ;;  %v2872_v46 = vld [vmem:[#allocation5 + $0x428] ss:$16 sps:$4 sm:$0xff]   ;;  %v2883_v49 = vld [vmem:[#allocation5 + $0x3cc] ss:$16 sps:$4 sm:$0xff]  }
  0x9d   :  { %1460 = vmatprep.subr.bf16.mxu1 %v2788_v48  ;;  %v2880_v48 = vld [vmem:[#allocation5 + $0x40c] ss:$16 sps:$4 sm:$0xff]  }
  0x9f   :  { %1383 = vmatpush2.bf16.msra.mxu0 %v2789_v52  ;;  %v2881_v52 = vld [vmem:[#allocation5 + $0x3c8] ss:$16 sps:$4 sm:$0xff]  }
  0xa0   :  { %1461 = vmatpush2.bf16.msra.mxu1 %v2786_v50  ;;  %1384 = vmatprep.subr.bf16.mxu0 %v2797_v54  ;;  %v2878_v50 = vld [vmem:[#allocation5 + $0x408] ss:$16 sps:$4 sm:$0xff]   ;;  %v2889_v54 = vld [vmem:[#allocation5 + $0x3ac] ss:$16 sps:$4 sm:$0xff]  }
  0xa1   :  { %1462 = vmatprep.subr.bf16.mxu1 %v2794_v53  ;;  %v2886_v53 = vld [vmem:[#allocation5 + $0x5ec] ss:$16 sps:$4 sm:$0xff]  }
  0xa3   :  { %1385 = vmatpush2.bf16.msra.mxu0 %v2795_v56  ;;  %v2887_v56 = vld [vmem:[#allocation5 + $0x3a8] ss:$16 sps:$4 sm:$0xff]  }
  0xa4   :  { %1463 = vmatpush2.bf16.msra.mxu1 %v2792_v55  ;;  %1386 = vmatprep.subr.bf16.mxu0 %v2803_v58  ;;  %v2884_v55 = vld [vmem:[#allocation5 + $0x5e8] ss:$16 sps:$4 sm:$0xff]   ;;  %v2895_v58 = vld [vmem:[#allocation5 + $0x38c] ss:$16 sps:$4 sm:$0xff]  }
  0xa5   :  { %1464 = vmatprep.subr.bf16.mxu1 %v2800_v57  ;;  %v2892_v57 = vld [vmem:[#allocation5 + $0x5cc] ss:$16 sps:$4 sm:$0xff]  }
  0xa7   :  { %1387 = vmatpush2.bf16.msra.mxu0 %v2801_v60  ;;  %v2893_v60 = vld [vmem:[#allocation5 + $0x388] ss:$16 sps:$4 sm:$0xff]  }
  0xa8   :  { %1465 = vmatpush2.bf16.msra.mxu1 %v2798_v59  ;;  %1388 = vmatprep.subr.bf16.mxu0 %v2809_v62  ;;  %v2890_v59 = vld [vmem:[#allocation5 + $0x5c8] ss:$16 sps:$4 sm:$0xff]   ;;  %v2901_v62 = vld [vmem:[#allocation5 + $0x36c] ss:$16 sps:$4 sm:$0xff]  }
  0xa9   :  { %1466 = vmatprep.subr.bf16.mxu1 %v2806_v61  ;;  %v2898_v61 = vld [vmem:[#allocation5 + $0x5ac] ss:$16 sps:$4 sm:$0xff]  }
  0xab   :  { %1389 = vmatpush2.bf16.msra.mxu0 %v2807_v0  ;;  %v2899_v0 = vld [vmem:[#allocation5 + $0x368] ss:$16 sps:$4 sm:$0xff]  }
  0xac   :  { %1467 = vmatpush2.bf16.msra.mxu1 %v2804_v63  ;;  %1390 = vmatprep.subr.bf16.mxu0 %v2815_v2  ;;  %v2896_v63 = vld [vmem:[#allocation5 + $0x5a8] ss:$16 sps:$4 sm:$0xff]   ;;  %v2907_v2 = vld [vmem:[#allocation5 + $0x34c] ss:$16 sps:$4 sm:$0xff]  }
  0xad   :  { %1468 = vmatprep.subr.bf16.mxu1 %v2812_v1  ;;  %v2904_v1 = vld [vmem:[#allocation5 + $0x58c] ss:$16 sps:$4 sm:$0xff]  }
  0xaf   :  { %1391 = vmatpush2.bf16.msra.mxu0 %v2813_v4  ;;  %v2905_v4 = vld [vmem:[#allocation5 + $0x348] ss:$16 sps:$4 sm:$0xff]  }
  0xb0   :  { %1469 = vmatpush2.bf16.msra.mxu1 %v2810_v3  ;;  %1392 = vmatprep.subr.bf16.mxu0 %v2821_v8  ;;  %v2902_v3 = vld [vmem:[#allocation5 + $0x588] ss:$16 sps:$4 sm:$0xff]   ;;  %v2913_v8 = vld [vmem:[#allocation5 + $0x32c] ss:$16 sps:$4 sm:$0xff]  }
  0xb1   :  { %1470 = vmatprep.subr.bf16.mxu1 %v2818_v5  ;;  %v2910_v5 = vld [vmem:[#allocation5 + $0x56c] ss:$16 sps:$4 sm:$0xff]  }
  0xb3   :  { %1393 = vmatpush2.bf16.msra.mxu0 %v2819_v10  ;;  %v2911_v10 = vld [vmem:[#allocation5 + $0x328] ss:$16 sps:$4 sm:$0xff]  }
  0xb4   :  { %1471 = vmatpush2.bf16.msra.mxu1 %v2816_v9  ;;  %1485 = vmatprep.subr.bf16.mxu0 %v2829_v12  ;;  %v2908_v9 = vld [vmem:[#allocation5 + $0x568] ss:$16 sps:$4 sm:$0xff]   ;;  %v2919_v12 = vld [vmem:[#allocation5 + $0x30c] ss:$16 sps:$4 sm:$0xff]  }
  0xb5   :  { %1472 = vmatprep.subr.bf16.mxu1 %v2826_v11  ;;  %v2916_v11 = vld [vmem:[#allocation5 + $0x54c] ss:$16 sps:$4 sm:$0xff]  }
  0xb6   :  { %1395 = vmatmul.mubr.bf16.vlgmr.msra.gmra.mxu0 %v3227_v14 }
  0xb7   :  { %1486 = vmatpush1.bf16.msra.mxu0 %v2827_v16  ;;  %1517 = vmatprep.mubr.bf16.mxu0 %v3202_v51  ;;  %v2851_v51 = vld [vmem:[#allocation5 + $0x268] ss:$16 sps:$4 sm:$0xff]  }
  0xb8   :  { %1473 = vmatpush2.bf16.msra.mxu1 %v2824_v15  ;;  %1487 = vmatprep.subr.bf16.mxu0 %v2835_v19  ;;  %v2914_v15 = vld [vmem:[#allocation5 + $0x548] ss:$16 sps:$4 sm:$0xff]   ;;  %v2931_v19 = vld [vmem:[#allocation7 + $0x74] ss:$8 sps:$4 sm:$0xff]  }
  0xb9   :  { %1474 = vmatprep.subr.bf16.mxu1 %v2832_v18  ;;  %v2917_v16 = vld [vmem:[#allocation5 + $0x308] ss:$16 sps:$4 sm:$0xff]   ;;  %v2922_v18 = vld [vmem:[#allocation5 + $0x52c] ss:$16 sps:$4 sm:$0xff]  }
  0xbb   :  { %1488 = vmatpush1.bf16.msra.mxu0 %v2833_v21  ;;  %v2929_v21 = vld [vmem:[#allocation7 + $0x70] ss:$8 sps:$4 sm:$0xff]  }
  0xbc   :  { %1475 = vmatpush2.bf16.msra.mxu1 %v2830_v20  ;;  %1489 = vmatprep.subr.bf16.mxu0 %v2841_v23  ;;  %v2920_v20 = vld [vmem:[#allocation5 + $0x528] ss:$16 sps:$4 sm:$0xff]   ;;  %v2934_v23 = vld [vmem:[#allocation7 + $0x64] ss:$8 sps:$4 sm:$0xff]  }
  0xbd   :  { %1526 = vmatprep.subr.bf16.mxu1 %v2838_v22  ;;  %v2925_v22 = vld [vmem:[#allocation5 + $0x50c] ss:$16 sps:$4 sm:$0xff]  }
  0xbf   :  { %1477 = vmatmul.mubr.bf16.vlgmr.msra.gmra.mxu1 %v3206_v6  ;;  %1490 = vmatpush1.bf16.msra.mxu0 %v2839_v25  ;;  %v2857_v6 = vld [vmem:[#allocation5 + $0x248] ss:$16 sps:$4 sm:$0xff]  }
  0xc0   :  { %1527 = vmatpush1.bf16.msra.mxu1 %v2836_v24  ;;  %1491 = vmatprep.subr.bf16.mxu0 %v2847_v27  ;;  %v2923_v24 = vld [vmem:[#allocation5 + $0x508] ss:$16 sps:$4 sm:$0xff]   ;;  %v2937_v27 = vld [vmem:[#allocation7 + $0x54] ss:$8 sps:$4 sm:$0xff]  }
  0xc1   :  { %1528 = vmatprep.subr.bf16.mxu1 %v2844_v26  ;;  %1558 = vmatprep.mubr.bf16.mxu1 %v3222_v33  ;;  %v2868_v33 = vld [vmem:[#allocation5 + $0x44c] ss:$16 sps:$4 sm:$0xff]   ;;  %v2932_v25 = vld [vmem:[#allocation7 + $0x60] ss:$8 sps:$4 sm:$0xff]  }
  0xc2   :  { %v2928_v26 = vld [vmem:[#allocation5 + $0x60c] ss:$16 sps:$4 sm:$0xff]  }
  0xc3   :  { %1492 = vmatpush1.bf16.msra.mxu0 %v2845_v29  ;;  %v2935_v29 = vld [vmem:[#allocation7 + $0x50] ss:$8 sps:$4 sm:$0xff]  }
  0xc4   :  { %1529 = vmatpush1.bf16.msra.mxu1 %v2842_v28  ;;  %1493 = vmatprep.subr.bf16.mxu0 %v2853_v31  ;;  %v2926_v28 = vld [vmem:[#allocation5 + $0x608] ss:$16 sps:$4 sm:$0xff]   ;;  %v2943_v31 = vld [vmem:[#allocation7 + $0x34] ss:$8 sps:$4 sm:$0xff]  }
  0xc5   :  { %1530 = vmatprep.subr.bf16.mxu1 %v2850_v30  ;;  %v2940_v30 = vld [vmem:[#allocation7 + $0x44] ss:$8 sps:$4 sm:$0xff]  }
  0xc7   :  { %1494 = vmatpush1.bf16.msra.mxu0 %v2851_v51  ;;  %v2977_v51 = vld [vmem:[#allocation7 + $0x170] ss:$8 sps:$4 sm:$0xff]  }
  0xc8   :  { %1531 = vmatpush1.bf16.msra.mxu1 %v2848_v32  ;;  %1495 = vmatprep.subr.bf16.mxu0 %v2859_v35  ;;  %v2941_v32 = vld [vmem:[#allocation7 + $0x30] ss:$8 sps:$4 sm:$0xff]   ;;  %v2946_v35 = vld [vmem:[#allocation7 + $0x24] ss:$8 sps:$4 sm:$0xff]  }
  0xc9   :  { %1532 = vmatprep.subr.bf16.mxu1 %v2856_v34  ;;  %v2979_v34 = vld [vmem:[#allocation7 + $0x174] ss:$8 sps:$4 sm:$0xff]  }
  0xcb   :  { %1496 = vmatpush1.bf16.msra.mxu0 %v2857_v6  ;;  %v2944_v6 = vld [vmem:[#allocation7 + $0x20] ss:$8 sps:$4 sm:$0xff]  }
  0xcc   :  { %1533 = vmatpush1.bf16.msra.mxu1 %v2854_v36  ;;  %1497 = vmatprep.subr.bf16.mxu0 %v2865_v38  ;;  %v2982_v36 = vld [vmem:[#allocation7 + $0x164] ss:$8 sps:$4 sm:$0xff]   ;;  %v2983_v38 = vld [vmem:[#allocation7 + $0x150] ss:$8 sps:$4 sm:$0xff]  }
  0xcd   :  { %1534 = vmatprep.subr.bf16.mxu1 %v2862_v37  ;;  %v2949_v37 = vld [vmem:[#allocation7 + $0x14] ss:$8 sps:$4 sm:$0xff]  }
  0xcf   :  { %1498 = vmatpush1.bf16.msra.mxu0 %v2863_v40  ;;  %v2988_v40 = vld [vmem:[#allocation7 + $0x144] ss:$8 sps:$4 sm:$0xff]  }
  0xd0   :  { %1535 = vmatpush1.bf16.msra.mxu1 %v2860_v39  ;;  %1499 = vmatprep.subr.bf16.mxu0 %v2871_v41  ;;  %v2947_v39 = vld [vmem:[#allocation7 + $0x10] ss:$8 sps:$4 sm:$0xff]   ;;  %v2986_v41 = vld [vmem:[#allocation7 + $0x140] ss:$8 sps:$4 sm:$0xff]  }
  0xd1   :  { %1536 = vmatprep.subr.bf16.mxu1 %v2868_v33  ;;  %v2952_v33 = vld [vmem:[#allocation7 + $0x4] ss:$8 sps:$4 sm:$0xff]  }
  0xd3   :  { %1500 = vmatpush1.bf16.msra.mxu0 %v2869_v43  ;;  %v2955_v43 = vld [vmem:[#allocation7 + $0xf4] ss:$8 sps:$4 sm:$0xff]  }
  0xd4   :  { %1537 = vmatpush1.bf16.msra.mxu1 %v2866_v42  ;;  %1501 = vmatprep.subr.bf16.mxu0 %v2877_v45  ;;  %v2991_v42 = vld [vmem:[#allocation7 + $0x134] ss:$8 sps:$4 sm:$0xff]   ;;  %v2953_v45 = vld [vmem:[#allocation7 + $0xf0] ss:$8 sps:$4 sm:$0xff]  }
  0xd5   :  { %1538 = vmatprep.subr.bf16.mxu1 %v2874_v44  ;;  %v2989_v44 = vld [vmem:[#allocation7 + $0x130] ss:$8 sps:$4 sm:$0xff]  }
  0xd7   :  { %1502 = vmatpush2.bf16.msra.mxu0 %v2875_v47  ;;  %v2958_v47 = vld [vmem:[#allocation7 + $0xe4] ss:$8 sps:$4 sm:$0xff]  }
  0xd8   :  { %1539 = vmatpush1.bf16.msra.mxu1 %v2872_v46  ;;  %1503 = vmatprep.subr.bf16.mxu0 %v2883_v49  ;;  %v2994_v46 = vld [vmem:[#allocation7 + $0x124] ss:$8 sps:$4 sm:$0xff]   ;;  %v2956_v49 = vld [vmem:[#allocation7 + $0xe0] ss:$8 sps:$4 sm:$0xff]  }
  0xd9   :  { %1540 = vmatprep.subr.bf16.mxu1 %v2880_v48  ;;  %v2992_v48 = vld [vmem:[#allocation7 + $0x120] ss:$8 sps:$4 sm:$0xff]  }
  0xdb   :  { %1504 = vmatpush2.bf16.msra.mxu0 %v2881_v52  ;;  %v2961_v52 = vld [vmem:[#allocation7 + $0xd4] ss:$8 sps:$4 sm:$0xff]  }
  0xdc   :  { %1541 = vmatpush1.bf16.msra.mxu1 %v2878_v50  ;;  %1505 = vmatprep.subr.bf16.mxu0 %v2889_v54  ;;  %v2997_v50 = vld [vmem:[#allocation7 + $0x114] ss:$8 sps:$4 sm:$0xff]   ;;  %v2959_v54 = vld [vmem:[#allocation7 + $0xd0] ss:$8 sps:$4 sm:$0xff]  }
  0xdd   :  { %1542 = vmatprep.subr.bf16.mxu1 %v2886_v53  ;;  %v2995_v53 = vld [vmem:[#allocation7 + $0x110] ss:$8 sps:$4 sm:$0xff]  }
  0xdf   :  { %1506 = vmatpush2.bf16.msra.mxu0 %v2887_v56  ;;  %v2964_v56 = vld [vmem:[#allocation7 + $0xc4] ss:$8 sps:$4 sm:$0xff]  }
  0xe0   :  { %1543 = vmatpush2.bf16.msra.mxu1 %v2884_v55  ;;  %1507 = vmatprep.subr.bf16.mxu0 %v2895_v58  ;;  %v3000_v55 = vld [vmem:[#allocation7 + $0x104] ss:$8 sps:$4 sm:$0xff]   ;;  %v2962_v58 = vld [vmem:[#allocation7 + $0xc0] ss:$8 sps:$4 sm:$0xff]  }
  0xe1   :  { %1544 = vmatprep.subr.bf16.mxu1 %v2892_v57  ;;  %v2998_v57 = vld [vmem:[#allocation7 + $0x100] ss:$8 sps:$4 sm:$0xff]  }
  0xe3   :  { %1508 = vmatpush2.bf16.msra.mxu0 %v2893_v60  ;;  %v2967_v60 = vld [vmem:[#allocation7 + $0xb4] ss:$8 sps:$4 sm:$0xff]  }
  0xe4   :  { %1545 = vmatpush2.bf16.msra.mxu1 %v2890_v59  ;;  %1509 = vmatprep.subr.bf16.mxu0 %v2901_v62  ;;  %v3003_v59 = vld [vmem:[#allocation7 + $0x1f4] ss:$8 sps:$4 sm:$0xff]   ;;  %v2965_v62 = vld [vmem:[#allocation7 + $0xb0] ss:$8 sps:$4 sm:$0xff]  }
  0xe5   :  { %1546 = vmatprep.subr.bf16.mxu1 %v2898_v61  ;;  %v3001_v61 = vld [vmem:[#allocation7 + $0x1f0] ss:$8 sps:$4 sm:$0xff]  }
  0xe7   :  { %1510 = vmatpush2.bf16.msra.mxu0 %v2899_v0  ;;  %v2970_v0 = vld [vmem:[#allocation7 + $0xa4] ss:$8 sps:$4 sm:$0xff]  }
  0xe8   :  { %1547 = vmatpush2.bf16.msra.mxu1 %v2896_v63  ;;  %1511 = vmatprep.subr.bf16.mxu0 %v2907_v2  ;;  %v3006_v63 = vld [vmem:[#allocation7 + $0x1e4] ss:$8 sps:$4 sm:$0xff]   ;;  %v2968_v2 = vld [vmem:[#allocation7 + $0xa0] ss:$8 sps:$4 sm:$0xff]  }
  0xe9   :  { %1548 = vmatprep.subr.bf16.mxu1 %v2904_v1  ;;  %v3004_v1 = vld [vmem:[#allocation7 + $0x1e0] ss:$8 sps:$4 sm:$0xff]  }
  0xeb   :  { %1512 = vmatpush2.bf16.msra.mxu0 %v2905_v4  ;;  %v2973_v4 = vld [vmem:[#allocation7 + $0x94] ss:$8 sps:$4 sm:$0xff]  }
  0xec   :  { %1549 = vmatpush2.bf16.msra.mxu1 %v2902_v3  ;;  %1513 = vmatprep.subr.bf16.mxu0 %v2913_v8  ;;  %v3009_v3 = vld [vmem:[#allocation7 + $0x1d4] ss:$8 sps:$4 sm:$0xff]   ;;  %v2971_v8 = vld [vmem:[#allocation7 + $0x90] ss:$8 sps:$4 sm:$0xff]  }
  0xed   :  { %1550 = vmatprep.subr.bf16.mxu1 %v2910_v5  ;;  %v3007_v5 = vld [vmem:[#allocation7 + $0x1d0] ss:$8 sps:$4 sm:$0xff]  }
  0xef   :  { %1514 = vmatpush2.bf16.msra.mxu0 %v2911_v10  ;;  %v2974_v10 = vld [vmem:[#allocation7 + $0x80] ss:$8 sps:$4 sm:$0xff]  }
  0xf0   :  { %1551 = vmatpush2.bf16.msra.mxu1 %v2908_v9  ;;  %1515 = vmatprep.subr.bf16.mxu0 %v2919_v12  ;;  %v2976_v9 = vld [vmem:[#allocation7 + $0x84] ss:$8 sps:$4 sm:$0xff]  }
  0xf1   :  { %1552 = vmatprep.subr.bf16.mxu1 %v2916_v11 }
  0xf3   :  { %1516 = vmatpush2.bf16.msra.mxu0 %v2917_v16 }
  0xf4   :  { %1553 = vmatpush2.bf16.msra.mxu1 %v2914_v15  ;;  %2008 = vmatprep.subr.bf16.mxu0 %v2931_v19  ;;  %v3012_v19 = vld [vmem:[#allocation7 + $0x1c4] ss:$8 sps:$4 sm:$0xff]  }
  0xf5   :  { %1554 = vmatprep.subr.bf16.mxu1 %v2922_v18 }
  0xf6   :  { %1518 = vmatmul.mubr.bf16.vlgmr.msra.gmra.mxu0 %v3208_v7  ;;  %v2938_v7 = vld [vmem:[#allocation7 + $0x40] ss:$8 sps:$4 sm:$0xff]  }
  0xf7   :  { %2009 = vmatpush1.bf16.msra.mxu0 %v2929_v21 }
  0xf8   :  { %1555 = vmatpush2.bf16.msra.mxu1 %v2920_v20  ;;  %2010 = vmatprep.subr.bf16.mxu0 %v2934_v23  ;;  %v3010_v20 = vld [vmem:[#allocation7 + $0x1c0] ss:$8 sps:$4 sm:$0xff]  }
  0xf9   :  { %1556 = vmatprep.subr.bf16.mxu1 %v2925_v22 }
  0xfb   :  { %2011 = vmatpush1.bf16.msra.mxu0 %v2932_v25  ;;  %v3015_v25 = vld [vmem:[#allocation7 + $0x1b4] ss:$8 sps:$4 sm:$0xff]  }
  0xfc   :  { %1557 = vmatpush2.bf16.msra.mxu1 %v2923_v24  ;;  %2012 = vmatprep.subr.bf16.mxu0 %v2937_v27 }
  0xfd   :  { %1581 = vmatprep.subr.bf16.mxu1 %v2928_v26  ;;  %v3013_v26 = vld [vmem:[#allocation7 + $0x1b0] ss:$8 sps:$4 sm:$0xff]  }
  0xff   :  { %1559 = vmatmul.mubr.bf16.vlgmr.msra.gmra.mxu1 %v3227_v14  ;;  %2013 = vmatpush1.bf16.msra.mxu0 %v2935_v29  ;;  %v2980_v14 = vld [vmem:[#allocation7 + $0x160] ss:$8 sps:$4 sm:$0xff]   ;;  %v3018_v29 = vld [vmem:[#allocation7 + $0x1a4] ss:$8 sps:$4 sm:$0xff]  }
 0x100   :  { %1582 = vmatpush1.bf16.msra.mxu1 %v2926_v28  ;;  %1599 = vmatprep.mubr.bf16.mxu1 %v3159_v13  ;;  %v2985_v13 = vld [vmem:[#allocation7 + $0x154] ss:$8 sps:$4 sm:$0xff]  }
 0x101   :  { %2014 = vmatprep.subr.bf16.mxu0 %v2940_v30  ;;  %2049 = vmatprep.subr.bf16.mxu1 %v2979_v34  ;;  %v3016_v30 = vld [vmem:[#allocation7 + $0x1a0] ss:$8 sps:$4 sm:$0xff]   ;;  %v3024_v34 = vld [vmem:[#allocation7 + $0x184] ss:$8 sps:$4 sm:$0xff]  }
 0x103   :  { %2015 = vmatpush1.bf16.msra.mxu0 %v2938_v7 }
 0x104   :  { %2016 = vmatprep.subr.bf16.mxu0 %v2943_v31 }
 0x107   :  { %2492 = vmatmul.mubr.msk.bf16.vlgmr.msra.gmra.mxu1 %vm1276_vm0, %v3213_v17  ;;  %2017 = vmatpush1.bf16.msra.mxu0 %v2941_v32  ;;  %v2950_v17 = vld [vmem:[#allocation7] ss:$8 sps:$4 sm:$0xff]   ;;  %v3021_v32 = vld [vmem:[#allocation7 + $0x194] ss:$8 sps:$4 sm:$0xff]  }
 0x108   :  { %2050 = vmatpush1.bf16.msra.mxu1 %v2977_v51  ;;  %2018 = vmatprep.subr.bf16.mxu0 %v2946_v35  ;;  %v3019_v51 = vld [vmem:[#allocation7 + $0x190] ss:$8 sps:$4 sm:$0xff]   ;;  %v3022_v35 = vld [vmem:[#allocation7 + $0x180] ss:$8 sps:$4 sm:$0xff]  }
 0x109   :  { %2051 = vmatprep.subr.bf16.mxu1 %v2982_v36 }
 0x10b   :  { %2019 = vmatpush1.bf16.msra.mxu0 %v2944_v6 }
 0x10c   :  { %2052 = vmatpush1.bf16.msra.mxu1 %v2980_v14  ;;  %2020 = vmatprep.subr.bf16.mxu0 %v2949_v37 }
 0x10d   :  { %2053 = vmatprep.subr.bf16.mxu1 %v2985_v13 }
 0x10f   :  { %2021 = vmatpush1.bf16.msra.mxu0 %v2947_v39 }
 0x110   :  { %2054 = vmatpush1.bf16.msra.mxu1 %v2983_v38  ;;  %2022 = vmatprep.subr.bf16.mxu0 %v2952_v33 }
 0x111   :  { %2055 = vmatprep.subr.bf16.mxu1 %v2988_v40 }
 0x113   :  { %2023 = vmatpush1.bf16.msra.mxu0 %v2950_v17  ;;  %v3160_v17 = vmov 1.0|1.0  }
 0x114   :  { %2056 = vmatpush1.bf16.msra.mxu1 %v2986_v41  ;;  %2024 = vmatprep.subr.bf16.mxu0 %v2955_v43 }
 0x115   :  { %2057 = vmatprep.subr.bf16.mxu1 %v2991_v42 }
 0x117   :  { %2025 = vmatpush2.bf16.msra.mxu0 %v2953_v45 }
 0x118   :  { %2058 = vmatpush1.bf16.msra.mxu1 %v2989_v44  ;;  %2026 = vmatprep.subr.bf16.mxu0 %v2958_v47 }
 0x119   :  { %2059 = vmatprep.subr.bf16.mxu1 %v2994_v46 }
 0x11b   :  { %2027 = vmatpush2.bf16.msra.mxu0 %v2956_v49 }
 0x11c   :  { %2060 = vmatpush1.bf16.msra.mxu1 %v2992_v48  ;;  %2028 = vmatprep.subr.bf16.mxu0 %v2961_v52 }
 0x11d   :  { %2061 = vmatprep.subr.bf16.mxu1 %v2997_v50 }
 0x11f   :  { %2029 = vmatpush2.bf16.msra.mxu0 %v2959_v54 }
 0x120   :  { %2062 = vmatpush1.bf16.msra.mxu1 %v2995_v53  ;;  %2030 = vmatprep.subr.bf16.mxu0 %v2964_v56 }
 0x121   :  { %2063 = vmatprep.subr.bf16.mxu1 %v3000_v55 }
 0x123   :  { %2031 = vmatpush2.bf16.msra.mxu0 %v2962_v58  ;;  %v3025_v58 = vld [vmem:[#allocation8 + $0x78] sm:$0xff]  }
 0x124   :  { %2064 = vmatpush1.bf16.msra.mxu1 %v2998_v57  ;;  %2032 = vmatprep.subr.bf16.mxu0 %v2967_v60  ;;  %v3027_v60 = vld [vmem:[#allocation8 + $0x70] sm:$0xff]  }
 0x125   :  { %2065 = vmatprep.subr.bf16.mxu1 %v3003_v59  ;;  %v3026_v59 = vld [vmem:[#allocation8 + $0x38] sm:$0xff]  }
 0x127   :  { %2033 = vmatpush2.bf16.msra.mxu0 %v2965_v62 }
 0x128   :  { %2066 = vmatpush2.bf16.msra.mxu1 %v3001_v61  ;;  %2034 = vmatprep.subr.bf16.mxu0 %v2970_v0 }
 0x129   :  { %2067 = vmatprep.subr.bf16.mxu1 %v3006_v63 }
 0x12b   :  { %2035 = vmatpush2.bf16.msra.mxu0 %v2968_v2 }
 0x12c   :  { %2068 = vmatpush2.bf16.msra.mxu1 %v3004_v1  ;;  %2036 = vmatprep.subr.bf16.mxu0 %v2973_v4  ;;  %v3028_v1 = vld [vmem:[#allocation8 + $0x30] sm:$0xff]  }
 0x12d   :  { %2069 = vmatprep.subr.bf16.mxu1 %v3009_v3  ;;  %v3029_v3 = vld [vmem:[#allocation8 + $0x68] sm:$0xff]  }
 0x12f   :  { %2037 = vmatpush2.bf16.msra.mxu0 %v2971_v8  ;;  %v3031_v8 = vld [vmem:[#allocation8 + $0x60] sm:$0xff]  }
 0x130   :  { %2070 = vmatpush2.bf16.msra.mxu1 %v3007_v5  ;;  %2038 = vmatprep.subr.bf16.mxu0 %v2976_v9  ;;  %v3030_v5 = vld [vmem:[#allocation8 + $0x28] sm:$0xff]   ;;  %v3032_v9 = vld [vmem:[#allocation8 + $0x20] sm:$0xff]  }
 0x131   :  { %2071 = vmatprep.subr.bf16.mxu1 %v3012_v19  ;;  %v3039_v19 = vld [vmem:[#allocation8 + $0x40] sm:$0xff]  }
 0x133   :  { %2039 = vmatpush2.bf16.msra.mxu0 %v2974_v10  ;;  %v3033_v10 = vld [vmem:[#allocation8 + $0x58] sm:$0xff]  }
 0x134   :  { %2072 = vmatpush2.bf16.msra.mxu1 %v3010_v20  ;;  %2592 = vmatprep.subr.bf16.mxu0 %v3025_v58  ;;  %v3040_v20 = vld [vmem:[#allocation8] sm:$0xff]  }
 0x135   :  { %2073 = vmatprep.subr.bf16.mxu1 %v3015_v25 }
 0x136   :  { %v1314_v11 = vpop.f32.mrf.mxu0 }
 0x137   :  { %v1355_v12 = vpop.f32.mrf.mxu1 }
 0x138   :  { %v1356_v15 = vadd.f32 %v1355_v12, %v1314_v11  ;;  %v1316_v16 = vpop.f32.mrf.mxu0  ;;  %2074 = vmatpush2.bf16.msra.mxu1 %v3013_v26  ;;  %v3034_v11 = vld [vmem:[#allocation8 + $0x18] sm:$0xff]   ;;  %v3035_v12 = vld [vmem:[#allocation8 + $0x50] sm:$0xff]  }
 0x139   :  { %v1357_v18 = vpop.f32.mrf.mxu1  ;;  %2075 = vmatprep.subr.bf16.mxu1 %v3018_v29 }
 0x13a   :  { %v1318_v22 = vpop.f32.mrf.mxu0  ;;  %v1358_v14 = vadd.f32 %v1357_v18, %v1316_v16  ;;  %v3037_v16 = vld [vmem:[#allocation8 + $0x48] sm:$0xff]  }
 0x13b   :  { %v1359_v21 = vpop.f32.mrf.mxu1  ;;  %v3038_v18 = vld [vmem:[#allocation8 + $0x8] sm:$0xff]  }
 0x13c   :  { %v1319_v24 = vpop.f32.mrf.mxu0  ;;  %2076 = vmatpush2.bf16.msra.mxu1 %v3016_v30 }
 0x13d   :  { %v1360_v23 = vpop.f32.mrf.mxu1  ;;  %2077 = vmatprep.subr.bf16.mxu1 %v3021_v32 }
 0x13f   :  { %v1437_v27 = vpop.f32.mrf.mxu1 }
 0x140   :  { %2078 = vmatpush2.bf16.msra.mxu1 %v3019_v51 }
 0x141   :  { %v1439_v28 = vpop.f32.mrf.mxu1  ;;  %2079 = vmatprep.subr.bf16.mxu1 %v3024_v34  ;;  %v3162_v34 = vmov 0.0  }
 0x143   :  { %v1441_v7 = vpop.f32.mrf.mxu1 }
 0x144   :  { %2080 = vmatpush2.bf16.msra.mxu1 %v3022_v35 }
 0x145   :  { %v1442_v31 = vpop.f32.mrf.mxu1 }
 0x176   :  { %v1396_v36 = vpop.f32.mrf.mxu0 }
 0x177   :  { %v1397_v6 = vadd.f32 %v1396_v36, %v1356_v15  ;;  %v3036_v15 = vld [vmem:[#allocation8 + $0x10] sm:$0xff]  }
 0x178   :  { %v1398_v13 = vpop.f32.mrf.mxu0 }
 0x179   :  { %v1438_v37 = vadd.f32 %v1437_v27, %v1397_v6  ;;  %v1399_v38 = vadd.f32 %v1398_v13, %v1358_v14 }
 0x17a   :  { %v1400_v39 = vpop.f32.mrf.mxu0 }
 0x17b   :  { %v1440_v40 = vadd.f32 %v1439_v28, %v1399_v38  ;;  %vm1608_vm1 = vcmp.ge.f32.partialorder %v1438_v37, 1.0 }
 0x17c   :  { %v1401_v33 = vpop.f32.mrf.mxu0  ;;  %vm2563_vm4 = vmpackc.low %vm1608_vm1, %vm1608_vm1 }
 0x17d   :  { %vm1609_vm2 = vcmp.ge.f32.partialorder %v1440_v40, 1.0 }
 0x17e   :  { %vm2561_vm3 = vmpackc.low %vm1609_vm2, %vm1609_vm2 }
 0x17f   :  { %v1478_v41 = vpop.f32.mrf.mxu1  ;;  %2562 = vmatprep.mubr.msk.bf16.mxu0 %vm2561_vm3, %v3160_v17 }
 0x180   :  { %2564 = vmatmul.mubr.msk.bf16.vlgmr.msra.gmra.mxu0 %vm2563_vm4, %v3160_v17 }
 0x181   :  { %v1480_v42 = vpop.f32.mrf.mxu1  ;;  %2593 = vmatpush3.bf16.msra.mxu0 %v3026_v59 }
 0x182   :  { %2594 = vmatprep.subr.bf16.mxu0 %v3027_v60 }
 0x183   :  { %v1482_v43 = vpop.f32.mrf.mxu1 }
 0x185   :  { %v1483_v44 = vpop.f32.mrf.mxu1  ;;  %2595 = vmatpush3.bf16.msra.mxu0 %v3028_v1 }
 0x186   :  { %2596 = vmatprep.subr.bf16.mxu0 %v3029_v3 }
 0x189   :  { %2597 = vmatpush3.bf16.msra.mxu0 %v3030_v5 }
 0x18a   :  { %2598 = vmatprep.subr.bf16.mxu0 %v3031_v8 }
 0x18d   :  { %2599 = vmatpush3.bf16.msra.mxu0 %v3032_v9 }
 0x18e   :  { %2600 = vmatprep.subr.bf16.mxu0 %v3033_v10 }
 0x191   :  { %2601 = vmatpush3.bf16.msra.mxu0 %v3034_v11 }
 0x192   :  { %2602 = vmatprep.subr.bf16.mxu0 %v3035_v12 }
 0x195   :  { %2603 = vmatpush3.bf16.msra.mxu0 %v3036_v15 }
 0x196   :  { %2604 = vmatprep.subr.bf16.mxu0 %v3037_v16 }
 0x199   :  { %2605 = vmatpush3.bf16.msra.mxu0 %v3038_v18 }
 0x19a   :  { %2606 = vmatprep.subr.bf16.mxu0 %v3039_v19 }
 0x19d   :  { %2607 = vmatpush3.bf16.msra.mxu0 %v3040_v20 }
 0x1b6   :  { %v1519_v45 = vpop.f32.mrf.mxu0 }
 0x1b7   :  { %v1520_v53 = vadd.f32 %v1519_v45, %v1478_v41 }
 0x1b8   :  { %v1521_v46 = vpop.f32.mrf.mxu0 }
 0x1b9   :  { %v1522_v55 = vadd.f32 %v1521_v46, %v1480_v42 }
 0x1ba   :  { %v1523_v47 = vpop.f32.mrf.mxu0 }
 0x1bc   :  { %v1524_v48 = vpop.f32.mrf.mxu0 }
 0x1bf   :  { %v1560_v49 = vpop.f32.mrf.mxu1 }
 0x1c0   :  { %v1561_v56 = vadd.f32 %v1560_v49, %v1520_v53 }
 0x1c1   :  { %v1562_v50 = vpop.f32.mrf.mxu1 }
 0x1c2   :  { %v1563_v61 = vadd.f32 %v1562_v50, %v1522_v55 }
 0x1c3   :  { %v1564_v52 = vpop.f32.mrf.mxu1 }
 0x1c5   :  { %v1565_v54 = vpop.f32.mrf.mxu1 }
 0x1c7   :  { %v1601_v57 = vpop.f32.mrf.mxu1 }
 0x1c8   :  { %v1602_v62 = vadd.f32 %v1601_v57, %v1561_v56 }
 0x1c9   :  { %v1603_v63 = vpop.f32.mrf.mxu1 }
 0x1ca   :  { %v1604_v0 = vadd.f32 %v1603_v63, %v1563_v61  ;;  %vm1610_vm5 = vcmp.ge.f32.partialorder %v1602_v62, 1.0 }
 0x1cb   :  { %v1605_v2 = vpop.f32.mrf.mxu1  ;;  %vm2567_vm8 = vmpackc.low %vm1610_vm5, %vm1610_vm5 }
 0x1cc   :  { %vm1611_vm6 = vcmp.ge.f32.partialorder %v1604_v0, 1.0 }
 0x1cd   :  { %vm2565_vm7 = vmpackc.low %vm1611_vm6, %vm1611_vm6  ;;  %v1606_v4 = vpop.f32.mrf.mxu1 }
 0x1ce   :  { %2566 = vmatprep.mubr.msk.bf16.mxu1 %vm2565_vm7, %v3160_v17 }
 0x1cf   :  { %2568 = vmatmul.mubr.msk.bf16.vlgmr.msra.gmra.mxu1 %vm2567_vm8, %v3160_v17 }
 0x240   :  { %v2042_v21 = vpop.f32.mrf.mxu0 }
 0x242   :  { %v2044_v22 = vpop.f32.mrf.mxu0 }
 0x244   :  { %v2046_v23 = vpop.f32.mrf.mxu0 }
 0x246   :  { %v2047_v24 = vpop.f32.mrf.mxu0 }
 0x28f   :  { %v2083_v25 = vpop.f32.mrf.mxu1 }
 0x290   :  { %v2084_v26 = vadd.f32 %v2083_v25, %v2042_v21 }
 0x291   :  { %v2085_v27 = vpop.f32.mrf.mxu1 }
 0x292   :  { %v2086_v28 = vadd.f32 %v2085_v27, %v2044_v22  ;;  %vm2090_vm9 = vcmp.ge.f32.partialorder %v2084_v26, 1.0 }
 0x293   :  { %v2087_v29 = vpop.f32.mrf.mxu1  ;;  %vm2589_vm12 = vmpackc.low %vm2090_vm9, %vm2090_vm9 }
 0x294   :  { %vm2091_vm10 = vcmp.ge.f32.partialorder %v2086_v28, 1.0 }
 0x295   :  { %vm2587_vm11 = vmpackc.low %vm2091_vm10, %vm2091_vm10  ;;  %v2088_v30 = vpop.f32.mrf.mxu1 }
 0x296   :  { %2588 = vmatprep.mubr.msk.bf16.mxu0 %vm2587_vm11, %v3160_v17 }
 0x297   :  { %2590 = vmatmul.mubr.msk.bf16.vlgmr.msra.gmra.mxu0 %vm2589_vm12, %v3160_v17 }
 0x357   :  { %v2608_v7 = vpop.f32.mrf.mxu0 }
 0x359   :  { %v2609_v31 = vpop.f32.mrf.mxu0 }
 0x35a   :  { %v2610_v32 = vadd.f32 %v2609_v31, %v2608_v7 }
 0x35b   :  { %v2611_v51 = vpop.f32.mrf.mxu0 }
 0x35c   :  { %vm2266_vm13 = vcmp.ge.f32.partialorder %v2610_v32, 1.0 }
 0x35d   :  { %v2591_v35 = vsel %vm2266_vm13, 1.0, %v3162_v34  ;;  %v2612_v36 = vpop.f32.mrf.mxu0 }
 0x35e   :  { %v2269_v14 = vpack.c.bf16 %v2591_v35, %v2591_v35 }
 0x360   :  { %2270 = vst [vmem:[#allocation10] sm:$0xf] %v2269_v14 }
 0x361   :  { %3132 = shalt.err (!%p3129_p10)
}
 0x362   :  { %2280 = dma.vmem_to_hbm [thread:$0]  %s2278_s3, 64, %s3251_s4, [#allocation4]  }
 0x363   :  { %3147 = dma.done.wait [#allocation4], 64  }
 0x364   :  { %3148 = vsyncadd [#allocation4], 4294967232 }
 0x365   :  { %2284 = vsyncpa [#allocation3], 1 }
 0x366   :  { %2285 = vsyncpa [#allocation6], 1 }
 0x367   :  { %2286 = vsyncpa [#allocation9], 1 }
 0x368   :  { %2287 = vsyncpa [#allocation4], 1 }

</bundles_post_ra>
